<compile_context>
chip_gen: v5e
topology: v5e:2x2
jax: 0.10.0
libtpu: 0.0.40
codegen_flags: <defaults>
</compile_context>

<pallas_src>
import functools

import jax
import jax.numpy as jnp
from jax.experimental import pallas as pl
from jax.experimental.pallas import tpu as pltpu


LANE = 128          # last-dim tiling (vreg lane width)
SUBLANE = 8         # second-to-last-dim tiling


def _round_up(x, m):
    return (x + m - 1) // m * m


# --------------------------------------------------------------------------- #
# Kernel
# --------------------------------------------------------------------------- #
def mlp_hyper_kernel(x_ref, w1_ref, b1_ref, w2_ref, b2_ref, w3_ref, b3_ref, o_ref):
    """One batch tile: (TM, IN_P) -> (TM, OUT_P). All accumulation + elementwise in f32."""
    x = x_ref[...]

    # fc1 + ReLU
    h1 = jnp.dot(x, w1_ref[...], preferred_element_type=jnp.float32)
    h1 = jnp.maximum(h1 + b1_ref[...], 0.0)
    h1 = h1.astype(w2_ref.dtype)

    # fc2 + ReLU
    h2 = jnp.dot(h1, w2_ref[...], preferred_element_type=jnp.float32)
    h2 = jnp.maximum(h2 + b2_ref[...], 0.0)
    h2 = h2.astype(w3_ref.dtype)

    # fc3 (no activation)
    h3 = jnp.dot(h2, w3_ref[...], preferred_element_type=jnp.float32)
    o_ref[...] = (h3 + b3_ref[...]).astype(o_ref.dtype)


# --------------------------------------------------------------------------- #
# Parameter prep (done once, outside the per-call path)
# --------------------------------------------------------------------------- #
def prepare_params(params, compute_dtype=jnp.bfloat16):
    """Transpose PyTorch-layout weights to (in, out), zero-pad feature dims to
    multiples of 128 (256 for large dims on the 256-wide MXUs), and cast matmul
    operands to `compute_dtype`. Biases stay f32 (added to the f32 accumulator)."""
    in_dim, hid_dim = params["fc1_w"].shape[1], params["fc1_w"].shape[0]
    out_dim = params["fc3_w"].shape[0]

    def _align(dim):
        return _round_up(dim, 256 if dim >= 512 else LANE)

    in_p = _round_up(in_dim, LANE)
    hid_p = _align(hid_dim)
    out_p = _align(out_dim)

    def pad_w(w_t, rows_p, cols_p):  # w_t is (in, out)
        r, c = w_t.shape
        return jnp.pad(w_t, ((0, rows_p - r), (0, cols_p - c))).astype(compute_dtype)

    def pad_b(b, cols_p):
        return jnp.pad(b, (0, cols_p - b.shape[0]))[None, :].astype(jnp.float32)

    return dict(
        w1=pad_w(params["fc1_w"].T, in_p, hid_p),
        b1=pad_b(params["fc1_b"], hid_p),
        w2=pad_w(params["fc2_w"].T, hid_p, hid_p),
        b2=pad_b(params["fc2_b"], hid_p),
        w3=pad_w(params["fc3_w"].T, hid_p, out_p),
        b3=pad_b(params["fc3_b"], out_p),
        dims=(in_dim, hid_dim, out_dim),
    )


# --------------------------------------------------------------------------- #
# VMEM / tile selection (all static Python)
# --------------------------------------------------------------------------- #
@functools.lru_cache(maxsize=1)
def _vmem_capacity_bytes():
    try:
        return int(pltpu.get_tpu_info().vmem_capacity_bytes)
    except Exception:
        return 64 << 20  # conservative default: v7x per-TC VMEM


def _choose_tile_and_vmem(batch, in_p, hid_p, out_p, w_bytes, out_bytes):
    """Largest batch tile (multiple of 8) fitting a generation-aware VMEM budget."""
    capacity = _vmem_capacity_bytes()
    # ~48 MiB working budget on v7x (64 MiB), ~100 MiB on v5e/v6e (128 MiB).
    budget = min(capacity - (16 << 20), (capacity * 25) // 32)

    # Resident weights + biases, single-buffered (pl.Buffered(1)).
    resident = w_bytes * (in_p * hid_p + hid_p * hid_p + hid_p * out_p)
    resident += 4 * (2 * hid_p + out_p)
    if resident > budget:
        # TODO(synk): add a hidden-dim-streamed w2/w3 path (extra "arbitrary" grid
        # axis + f32 accumulator scratch) for weights that do not fit VMEM.
        raise ValueError(
            f"Resident weights ({resident} B) exceed VMEM budget ({budget} B); "
            "streamed-weight path not implemented.")

    batch_p8 = _round_up(batch, SUBLANE)
    tm = SUBLANE
    for cand in (2048, 1024, 512, 256, 128, 64, 32, 16, 8):
        cand = min(cand, batch_p8)
        tiles = 2 * w_bytes * cand * in_p + 2 * out_bytes * cand * out_p  # double-buffered x/out
        interm = 4 * 4 * cand * hid_p                                     # h1/h2 f32 + headroom
        if resident + tiles + interm <= budget:
            tm = cand
            break

    # Keep >=2 grid steps when the batch allows it (v7x megacore sharding).
    if batch_p8 >= 2 * SUBLANE and tm >= batch_p8:
        tm = _round_up(batch_p8 // 2, SUBLANE)

    tiles = 2 * w_bytes * tm * in_p + 2 * out_bytes * tm * out_p
    interm = 4 * 4 * tm * hid_p
    vmem_limit = resident + tiles + interm + (4 << 20)
    vmem_limit = max(vmem_limit, min(32 << 20, capacity - (4 << 20)))
    vmem_limit = min(vmem_limit, capacity - (4 << 20))
    return int(tm), int(vmem_limit)


# --------------------------------------------------------------------------- #
# Jitted inner call (all config passed as static kwargs)
# --------------------------------------------------------------------------- #
@functools.partial(
    jax.jit,
    static_argnames=("in_dim", "out_dim", "in_p", "hid_p", "out_p",
                     "tm", "batch_p", "vmem_limit"))
def _mlp_forward_padded(x, w1, b1, w2, b2, w3, b3, *,
                        in_dim, out_dim, in_p, hid_p, out_p, tm, batch_p, vmem_limit):
    batch = x.shape[0]
    compute_dtype = w1.dtype
    w_bytes = jnp.dtype(compute_dtype).itemsize
    out_bytes = jnp.dtype(x.dtype).itemsize

    # Pad x only when needed (skip the extra HBM pass for aligned shapes).
    pad_rows = batch_p - batch
    pad_cols = in_p - in_dim
    x_p = x
    if pad_rows or pad_cols:
        x_p = jnp.pad(x_p, ((0, pad_rows), (0, pad_cols)))
    if x_p.dtype != compute_dtype:
        x_p = x_p.astype(compute_dtype)

    grid = (batch_p // tm,)
    resident = pl.Buffered(1)   # constant index_map -> single-buffer the weights/biases

    cost = pl.CostEstimate(
        flops=2 * batch_p * (in_p * hid_p + hid_p * hid_p + hid_p * out_p),
        transcendentals=0,
        bytes_accessed=(batch_p * in_p * w_bytes
                        + (in_p * hid_p + hid_p * hid_p + hid_p * out_p) * w_bytes
                        + (2 * hid_p + out_p) * 4
                        + batch_p * out_p * out_bytes),
    )

    out = pl.pallas_call(
        mlp_hyper_kernel,
        out_shape=jax.ShapeDtypeStruct((batch_p, out_p), x.dtype),
        grid=grid,
        in_specs=[
            pl.BlockSpec((tm, in_p), lambda i: (i, 0)),                              # x streams
            pl.BlockSpec((in_p, hid_p), lambda i: (0, 0), pipeline_mode=resident),   # w1 resident
            pl.BlockSpec((1, hid_p), lambda i: (0, 0), pipeline_mode=resident),      # b1 resident
            pl.BlockSpec((hid_p, hid_p), lambda i: (0, 0), pipeline_mode=resident),  # w2 resident
            pl.BlockSpec((1, hid_p), lambda i: (0, 0), pipeline_mode=resident),      # b2 resident
            pl.BlockSpec((hid_p, out_p), lambda i: (0, 0), pipeline_mode=resident),  # w3 resident
            pl.BlockSpec((1, out_p), lambda i: (0, 0), pipeline_mode=resident),      # b3 resident
        ],
        out_specs=pl.BlockSpec((tm, out_p), lambda i: (i, 0)),
        compiler_params=pltpu.CompilerParams(
            dimension_semantics=("parallel",),
            vmem_limit_bytes=vmem_limit,
        ),
        cost_estimate=cost,
    )(x_p, w1, b1, w2, b2, w3, b3)

    # Strip batch + lane padding (no-op slice when already aligned).
    if batch_p != batch or out_p != out_dim:
        out = out[:batch, :out_dim]
    return out


# --------------------------------------------------------------------------- #
# Forward wrapper (all static logic lives here, outside jit)
# --------------------------------------------------------------------------- #
def mlp_hyper_forward(x, prepared):
    in_dim, _, out_dim = prepared["dims"]
    in_p, hid_p = prepared["w1"].shape
    out_p = prepared["w3"].shape[1]
    batch = int(x.shape[0])

    w_bytes = jnp.dtype(prepared["w1"].dtype).itemsize
    out_bytes = jnp.dtype(x.dtype).itemsize
    tm, vmem_limit = _choose_tile_and_vmem(batch, in_p, hid_p, out_p, w_bytes, out_bytes)
    batch_p = _round_up(batch, tm)

    return _mlp_forward_padded(
        x, prepared["w1"], prepared["b1"], prepared["w2"], prepared["b2"],
        prepared["w3"], prepared["b3"],
        in_dim=in_dim, out_dim=out_dim, in_p=in_p, hid_p=hid_p, out_p=out_p,
        tm=tm, batch_p=batch_p, vmem_limit=vmem_limit)


# --------------------------------------------------------------------------- #
# Reference + init
# --------------------------------------------------------------------------- #
def mlp_hyper_ref(x, params):
    h = jnp.maximum(x @ params["fc1_w"].T + params["fc1_b"], 0.0)
    h = jnp.maximum(h @ params["fc2_w"].T + params["fc2_b"], 0.0)
    return h @ params["fc3_w"].T + params["fc3_b"]


def init_params(key, input_dim, hidden_dim, output_dim):
    """Deterministic init mimicking nn.Linear's uniform(-1/sqrt(fan_in), 1/sqrt(fan_in))."""
    ks = jax.random.split(key, 6)

    def linear(kw, kb, fan_in, fan_out):
        bound = 1.0 / jnp.sqrt(fan_in)
        w = jax.random.uniform(kw, (fan_out, fan_in), jnp.float32, -bound, bound)
        b = jax.random.uniform(kb, (fan_out,), jnp.float32, -bound, bound)
        return w, b

    fc1_w, fc1_b = linear(ks[0], ks[1], input_dim, hidden_dim)
    fc2_w, fc2_b = linear(ks[2], ks[3], hidden_dim, hidden_dim)
    fc3_w, fc3_b = linear(ks[4], ks[5], hidden_dim, output_dim)
    return dict(fc1_w=fc1_w, fc1_b=fc1_b,
                fc2_w=fc2_w, fc2_b=fc2_b,
                fc3_w=fc3_w, fc3_b=fc3_b)


if __name__ == "__main__":
    key = jax.random.PRNGKey(0)
    k_param, k_x = jax.random.split(key)

    batch, input_dim, hidden_dim, output_dim = 8, 16, 32, 8
    params = init_params(k_param, input_dim, hidden_dim, output_dim)
    x = jax.random.normal(k_x, (batch, input_dim), jnp.float32)

    ref = mlp_hyper_ref(x, params)

    # f32 MXU-operand path: tight tolerance.
    prepared_f32 = prepare_params(params, compute_dtype=jnp.float32)
    out_f32 = jax.block_until_ready(mlp_hyper_forward(x, prepared_f32))
    assert out_f32.shape == (batch, output_dim)
    assert jnp.allclose(out_f32, ref, atol=1e-4, rtol=1e-4)

    # Default bf16 MXU-operand path (f32 accumulation): loosened tolerance.
    prepared_bf16 = prepare_params(params)
    out_bf16 = jax.block_until_ready(mlp_hyper_forward(x, prepared_bf16))
    assert out_bf16.shape == (batch, output_dim)
    assert jnp.allclose(out_bf16, ref, atol=5e-2, rtol=5e-2)

    print("KERNEL_OK")
</pallas_src>

<mosaic_0001>
module attributes {stable_mosaic.version = 11 : i64} {
  func.func @mlp_hyper_kernel(%arg0: i32, %arg1: memref<8x128xf32, #tpu.memory_space<vmem>>, %arg2: memref<128x128xf32, #tpu.memory_space<vmem>>, %arg3: memref<1x128xf32, #tpu.memory_space<vmem>>, %arg4: memref<128x128xf32, #tpu.memory_space<vmem>>, %arg5: memref<1x128xf32, #tpu.memory_space<vmem>>, %arg6: memref<128x128xf32, #tpu.memory_space<vmem>>, %arg7: memref<1x128xf32, #tpu.memory_space<vmem>>, %arg8: memref<8x128xf32, #tpu.memory_space<vmem>>) attributes {dimension_semantics = [#tpu.dimension_semantics<parallel>], iteration_bounds = array<i64: 1>, scalar_prefetch = 0 : i64, scratch_operands = 0 : i64, tpu.core_type = #tpu.core_type<tc>, window_params = [{transform_indices = @transform_0, window_bounds = array<i64: 8, 128>}, {pipeline_mode = #tpu.pipeline_mode<synchronous>, transform_indices = @transform_1, window_bounds = array<i64: 128, 128>}, {pipeline_mode = #tpu.pipeline_mode<synchronous>, transform_indices = @transform_2, window_bounds = array<i64: 1, 128>}, {pipeline_mode = #tpu.pipeline_mode<synchronous>, transform_indices = @transform_3, window_bounds = array<i64: 128, 128>}, {pipeline_mode = #tpu.pipeline_mode<synchronous>, transform_indices = @transform_4, window_bounds = array<i64: 1, 128>}, {pipeline_mode = #tpu.pipeline_mode<synchronous>, transform_indices = @transform_5, window_bounds = array<i64: 128, 128>}, {pipeline_mode = #tpu.pipeline_mode<synchronous>, transform_indices = @transform_6, window_bounds = array<i64: 1, 128>}, {transform_indices = @transform_7, window_bounds = array<i64: 8, 128>}]} {
    %c0 = arith.constant 0 : index
    %c0_0 = arith.constant 0 : index
    %0 = vector.load %arg1[%c0, %c0_0] : memref<8x128xf32, #tpu.memory_space<vmem>>, vector<8x128xf32>
    %c0_1 = arith.constant 0 : index
    %c0_2 = arith.constant 0 : index
    %1 = vector.load %arg2[%c0_1, %c0_2] : memref<128x128xf32, #tpu.memory_space<vmem>>, vector<128x128xf32>
    %cst = arith.constant dense<0.000000e+00> : vector<8x128xf32>
    %2 = tpu.matmul %0, %1, %cst {dimension_numbers = #tpu.dot_dimension_numbers<[1], [0], [0], [1], [0, 0, 1, 1], [], []>} : vector<8x128xf32>, vector<128x128xf32>, vector<8x128xf32> -> vector<8x128xf32>
    %c0_3 = arith.constant 0 : index
    %c0_4 = arith.constant 0 : index
    %3 = vector.load %arg3[%c0_3, %c0_4] : memref<1x128xf32, #tpu.memory_space<vmem>>, vector<1x128xf32>
    %4 = vector.broadcast %3 : vector<1x128xf32> to vector<8x128xf32>
    %5 = arith.addf %2, %4 : vector<8x128xf32>
    %cst_5 = arith.constant 0.000000e+00 : f32
    %6 = vector.broadcast %cst_5 : f32 to vector<8x128xf32>
    %7 = arith.maximumf %5, %6 : vector<8x128xf32>
    %c0_6 = arith.constant 0 : index
    %c0_7 = arith.constant 0 : index
    %8 = vector.load %arg4[%c0_6, %c0_7] : memref<128x128xf32, #tpu.memory_space<vmem>>, vector<128x128xf32>
    %cst_8 = arith.constant dense<0.000000e+00> : vector<8x128xf32>
    %9 = tpu.matmul %7, %8, %cst_8 {dimension_numbers = #tpu.dot_dimension_numbers<[1], [0], [0], [1], [0, 0, 1, 1], [], []>} : vector<8x128xf32>, vector<128x128xf32>, vector<8x128xf32> -> vector<8x128xf32>
    %c0_9 = arith.constant 0 : index
    %c0_10 = arith.constant 0 : index
    %10 = vector.load %arg5[%c0_9, %c0_10] : memref<1x128xf32, #tpu.memory_space<vmem>>, vector<1x128xf32>
    %11 = vector.broadcast %10 : vector<1x128xf32> to vector<8x128xf32>
    %12 = arith.addf %9, %11 : vector<8x128xf32>
    %cst_11 = arith.constant 0.000000e+00 : f32
    %13 = vector.broadcast %cst_11 : f32 to vector<8x128xf32>
    %14 = arith.maximumf %12, %13 : vector<8x128xf32>
    %c0_12 = arith.constant 0 : index
    %c0_13 = arith.constant 0 : index
    %15 = vector.load %arg6[%c0_12, %c0_13] : memref<128x128xf32, #tpu.memory_space<vmem>>, vector<128x128xf32>
    %cst_14 = arith.constant dense<0.000000e+00> : vector<8x128xf32>
    %16 = tpu.matmul %14, %15, %cst_14 {dimension_numbers = #tpu.dot_dimension_numbers<[1], [0], [0], [1], [0, 0, 1, 1], [], []>} : vector<8x128xf32>, vector<128x128xf32>, vector<8x128xf32> -> vector<8x128xf32>
    %c0_15 = arith.constant 0 : index
    %c0_16 = arith.constant 0 : index
    %17 = vector.load %arg7[%c0_15, %c0_16] : memref<1x128xf32, #tpu.memory_space<vmem>>, vector<1x128xf32>
    %18 = vector.broadcast %17 : vector<1x128xf32> to vector<8x128xf32>
    %19 = arith.addf %16, %18 : vector<8x128xf32>
    %c0_17 = arith.constant 0 : index
    %c0_18 = arith.constant 0 : index
    %20 = vector.load %arg8[%c0_17, %c0_18] : memref<8x128xf32, #tpu.memory_space<vmem>>, vector<8x128xf32>
    tpu.vector_store %arg8[%c0_17, %c0_18], %19 {strides = array<i32>} : memref<8x128xf32, #tpu.memory_space<vmem>>, vector<8x128xf32>,
    return
  }
  func.func @transform_0(%arg0: i32) -> (i32, i32) {
    %c0_i32 = arith.constant 0 : i32
    %c0_i32_0 = arith.constant 0 : i32
    return %arg0, %c0_i32 : i32, i32
  }
  func.func @transform_1(%arg0: i32) -> (i32, i32) {
    %c0_i32 = arith.constant 0 : i32
    %c0_i32_0 = arith.constant 0 : i32
    %c0_i32_1 = arith.constant 0 : i32
    return %c0_i32, %c0_i32_0 : i32, i32
  }
  func.func @transform_2(%arg0: i32) -> (i32, i32) {
    %c0_i32 = arith.constant 0 : i32
    %c0_i32_0 = arith.constant 0 : i32
    %c0_i32_1 = arith.constant 0 : i32
    return %c0_i32, %c0_i32_0 : i32, i32
  }
  func.func @transform_3(%arg0: i32) -> (i32, i32) {
    %c0_i32 = arith.constant 0 : i32
    %c0_i32_0 = arith.constant 0 : i32
    %c0_i32_1 = arith.constant 0 : i32
    return %c0_i32, %c0_i32_0 : i32, i32
  }
  func.func @transform_4(%arg0: i32) -> (i32, i32) {
    %c0_i32 = arith.constant 0 : i32
    %c0_i32_0 = arith.constant 0 : i32
    %c0_i32_1 = arith.constant 0 : i32
    return %c0_i32, %c0_i32_0 : i32, i32
  }
  func.func @transform_5(%arg0: i32) -> (i32, i32) {
    %c0_i32 = arith.constant 0 : i32
    %c0_i32_0 = arith.constant 0 : i32
    %c0_i32_1 = arith.constant 0 : i32
    return %c0_i32, %c0_i32_0 : i32, i32
  }
  func.func @transform_6(%arg0: i32) -> (i32, i32) {
    %c0_i32 = arith.constant 0 : i32
    %c0_i32_0 = arith.constant 0 : i32
    %c0_i32_1 = arith.constant 0 : i32
    return %c0_i32, %c0_i32_0 : i32, i32
  }
  func.func @transform_7(%arg0: i32) -> (i32, i32) {
    %c0_i32 = arith.constant 0 : i32
    %c0_i32_0 = arith.constant 0 : i32
    return %arg0, %c0_i32 : i32, i32
  }
}

</mosaic_0001>

<bundles_post_ra>
// kernel: _mlp_forward_padded.1
= control target key start
LH: loop header
LB: loop body
LE: loop exit
PB: predicated region body
PF: predicated region fallthrough
CT: control target
= control target key end

     0   :  { %12 = vsyncpa [#allocation3], 0  ;;  %s397_s0 = inlined_call_operand.vmem [shape: f32[8,128], index: 0, kind: input, shape index: {}]   ;;  %s398_s1 = inlined_call_operand.hbm [shape: f32[128,128], index: 1, kind: input, shape index: {}]   ;;  %s399_s2 = inlined_call_operand.vmem [shape: f32[1,128], index: 2, kind: input, shape index: {}]   ;;  %s400_s3 = inlined_call_operand.hbm [shape: f32[128,128], index: 3, kind: input, shape index: {}]   ;;  %s401_s4 = inlined_call_operand.vmem [shape: f32[1,128], index: 4, kind: input, shape index: {}]   ;;  %s402_s5 = inlined_call_operand.hbm [shape: f32[128,128], index: 5, kind: input, shape index: {}]   ;;  %s403_s6 = inlined_call_operand.vmem [shape: f32[1,128], index: 6, kind: input, shape index: {}]   ;;  %s404_s7 = inlined_call_operand.hbm [shape: f32[8,128], index: 7, kind: output, shape index: {}]  }
   0x1   :  { %13 = vsyncpa [#allocation6], 0 }
   0x2   :  { %14 = vsyncpa [#allocation4], 0  ;;  %s36_s26 = sshll.u32 %s400_s3, 4  ;;  %s327_s27 = smov [#allocation5]   ;;  %s37_s26 = int_to_ptr.hbm [resolvable:$true] %s36_s26 }
   0x3   :  { %s38_s28 = sshll.u32 %s327_s27, 4  ;;  %s21_s8 = sshll.u32 %s398_s1, 4  ;;  %s39_s28 = int_to_ptr.vmem [resolvable:$true] %s38_s28  ;;  %s22_s8 = int_to_ptr.hbm [resolvable:$true] %s21_s8 }
   0x4   :  { %s328_s9 = smov 128   ;;  %s329_s10 = smov 8  }
   0x5   :  { %44 = dma.hbm_to_vmem [thread:$0]  %s37_s26, 2048, %s39_s28, [#allocation6], %s328_s9, %s328_s9, %s329_s10  }
   0x6   :  { %s330_s11 = smov [#allocation2]   ;;  %s51_s15 = sshll.u32 %s402_s5, 4  ;;  %s52_s15 = int_to_ptr.hbm [resolvable:$true] %s51_s15 }
   0x7   :  { %s23_s12 = sshll.u32 %s330_s11, 4  ;;  %s331_s3 = smov [#allocation7]   ;;  %s24_s12 = int_to_ptr.vmem [resolvable:$true] %s23_s12 }
   0x8   :  { %29 = dma.hbm_to_vmem [thread:$0]  %s22_s8, 2048, %s24_s12, [#allocation3], %s328_s9, %s328_s9, %s329_s10  }
   0x9   :  { %s53_s16 = sshll.u32 %s331_s3, 4  ;;  %s54_s16 = int_to_ptr.vmem [resolvable:$true] %s53_s16 }
   0xa   :  { %59 = dma.hbm_to_vmem [thread:$0]  %s52_s15, 2048, %s54_s16, [#allocation6], %s328_s9, %s328_s9, %s329_s10  }
   0xb   :  { %321 = dma.done.wait [#allocation3], 2048  }
   0xc   :  { %322 = vsyncadd [#allocation3], 4294965248 }
   0xd   :  { %323 = dma.done.wait [#allocation6], 4096  }
   0xe   :  { %324 = vsyncadd [#allocation6], 4294963200  ;;  %v90_v0 = vld [vmem:[#allocation2 + $0x78] sm:$0xff]  ;;  %v89_v1 = vld [vmem:[#allocation2 + $0x70] sm:$0xff]  ;;  %s332_s21 = smov [#allocation8]   ;;  %s205_s25 = sshll.u32 %s404_s7, 4  ;;  %s206_s25 = int_to_ptr.hbm [resolvable:$true] %s205_s25 }
   0xf   :  { %95 = vmatpush.msra.mxu0 %v90_v0  ;;  %v88_v2 = vld [vmem:[#allocation2 + $0x68] sm:$0xff]  ;;  %v87_v3 = vld [vmem:[#allocation2 + $0x60] sm:$0xff]  ;;  %v131_v4 = vld [vmem:[#allocation5 + $0x78] sm:$0xff]  ;;  %s203_s22 = sshll.u32 %s332_s21, 4  ;;  %s204_s22 = int_to_ptr.vmem [resolvable:$true] %s203_s22 }
  0x10   :  { %v86_v5 = vld [vmem:[#allocation2 + $0x58] sm:$0xff]  ;;  %136 = vmatpush.msra.mxu1 %v131_v4  ;;  %v130_v6 = vld [vmem:[#allocation5 + $0x70] sm:$0xff]  ;;  %v129_v7 = vld [vmem:[#allocation5 + $0x68] sm:$0xff] }
  0x11   :  { %96 = vmatpush.msra.mxu0 %v89_v1  ;;  %v85_v8 = vld [vmem:[#allocation2 + $0x50] sm:$0xff]  ;;  %v128_v9 = vld [vmem:[#allocation5 + $0x60] sm:$0xff]  ;;  %v84_v10 = vld [vmem:[#allocation2 + $0x48] sm:$0xff] }
  0x12   :  { %137 = vmatpush.msra.mxu1 %v130_v6  ;;  %v127_v11 = vld [vmem:[#allocation5 + $0x58] sm:$0xff]  ;;  %v83_v12 = vld [vmem:[#allocation2 + $0x40] sm:$0xff]  ;;  %v126_v13 = vld [vmem:[#allocation5 + $0x50] sm:$0xff] }
  0x13   :  { %97 = vmatpush.msra.mxu0 %v88_v2  ;;  %v82_v14 = vld [vmem:[#allocation2 + $0x38] sm:$0xff]  ;;  %v125_v15 = vld [vmem:[#allocation5 + $0x48] sm:$0xff]  ;;  %v81_v16 = vld [vmem:[#allocation2 + $0x30] sm:$0xff] }
  0x14   :  { %138 = vmatpush.msra.mxu1 %v129_v7  ;;  %v124_v17 = vld [vmem:[#allocation5 + $0x40] sm:$0xff]  ;;  %v80_v18 = vld [vmem:[#allocation2 + $0x28] sm:$0xff]  ;;  %v123_v19 = vld [vmem:[#allocation5 + $0x38] sm:$0xff] }
  0x15   :  { %98 = vmatpush.msra.mxu0 %v87_v3  ;;  %v79_v20 = vld [vmem:[#allocation2 + $0x20] sm:$0xff]  ;;  %v122_v21 = vld [vmem:[#allocation5 + $0x30] sm:$0xff]  ;;  %v78_v22 = vld [vmem:[#allocation2 + $0x18] sm:$0xff] }
  0x16   :  { %139 = vmatpush.msra.mxu1 %v128_v9  ;;  %v121_v23 = vld [vmem:[#allocation5 + $0x28] sm:$0xff]  ;;  %v77_v24 = vld [vmem:[#allocation2 + $0x10] sm:$0xff]  ;;  %v120_v25 = vld [vmem:[#allocation5 + $0x20] sm:$0xff] }
  0x17   :  { %99 = vmatpush.msra.mxu0 %v86_v5  ;;  %v76_v26 = vld [vmem:[#allocation2 + $0x8] sm:$0xff]  ;;  %v119_v27 = vld [vmem:[#allocation5 + $0x18] sm:$0xff]  ;;  %v75_v28 = vld [vmem:[#allocation2] sm:$0xff] }
  0x18   :  { %140 = vmatpush.msra.mxu1 %v127_v11  ;;  %v74_v29 = vld [vmem:[%s397_s0] sm:$0xff]  ;;  %v118_v30 = vld [vmem:[#allocation5 + $0x10] sm:$0xff]  ;;  %v117_v31 = vld [vmem:[#allocation5 + $0x8] sm:$0xff] }
  0x19   :  { %100 = vmatpush.msra.mxu0 %v85_v8  ;;  %v116_v32 = vld [vmem:[#allocation5] sm:$0xff]  ;;  %v172_v33 = vld [vmem:[#allocation7 + $0x78] sm:$0xff]  ;;  %v171_v34 = vld [vmem:[#allocation7 + $0x70] sm:$0xff] }
  0x1a   :  { %141 = vmatpush.msra.mxu1 %v126_v13  ;;  %177 = vmatpush.msra.mxu2 %v172_v33  ;;  %v170_v35 = vld [vmem:[#allocation7 + $0x68] sm:$0xff]  ;;  %v169_v36 = vld [vmem:[#allocation7 + $0x60] sm:$0xff]  ;;  %v168_v37 = vld [vmem:[#allocation7 + $0x58] sm:$0xff] }
  0x1b   :  { %101 = vmatpush.msra.mxu0 %v84_v10  ;;  %v167_v38 = vld [vmem:[#allocation7 + $0x50] sm:$0xff]  ;;  %v166_v39 = vld [vmem:[#allocation7 + $0x48] sm:$0xff]  ;;  %v165_v40 = vld [vmem:[#allocation7 + $0x40] sm:$0xff] }
  0x1c   :  { %142 = vmatpush.msra.mxu1 %v125_v15  ;;  %178 = vmatpush.msra.mxu2 %v171_v34  ;;  %v164_v41 = vld [vmem:[#allocation7 + $0x38] sm:$0xff]  ;;  %v163_v42 = vld [vmem:[#allocation7 + $0x30] sm:$0xff]  ;;  %v162_v43 = vld [vmem:[#allocation7 + $0x28] sm:$0xff] }
  0x1d   :  { %102 = vmatpush.msra.mxu0 %v83_v12  ;;  %v161_v44 = vld [vmem:[#allocation7 + $0x20] sm:$0xff]  ;;  %v160_v45 = vld [vmem:[#allocation7 + $0x18] sm:$0xff]  ;;  %v159_v50 = vld [vmem:[#allocation7 + $0x10] sm:$0xff] }
  0x1e   :  { %143 = vmatpush.msra.mxu1 %v124_v17  ;;  %179 = vmatpush.msra.mxu2 %v170_v35  ;;  %v222_v46 = vld [vmem:[%s399_s2] ss:$0 sm:$0xff]  ;;  %v158_v51 = vld [vmem:[#allocation7 + $0x8] sm:$0xff] }
  0x1f   :  { %103 = vmatpush.msra.mxu0 %v82_v14  ;;  %v157_v52 = vld [vmem:[#allocation7] sm:$0xff] }
  0x20   :  { %144 = vmatpush.msra.mxu1 %v123_v19  ;;  %180 = vmatpush.msra.mxu2 %v169_v36  ;;  %v223_v53 = vld [vmem:[%s401_s4] ss:$0 sm:$0xff] }
  0x21   :  { %104 = vmatpush.msra.mxu0 %v81_v16  ;;  %v224_v57 = vld [vmem:[%s403_s6] ss:$0 sm:$0xff] }
  0x22   :  { %145 = vmatpush.msra.mxu1 %v122_v21  ;;  %181 = vmatpush.msra.mxu2 %v168_v37 }
  0x23   :  { %105 = vmatpush.msra.mxu0 %v80_v18 }
  0x24   :  { %146 = vmatpush.msra.mxu1 %v121_v23  ;;  %182 = vmatpush.msra.mxu2 %v167_v38 }
  0x25   :  { %106 = vmatpush.msra.mxu0 %v79_v20 }
  0x26   :  { %147 = vmatpush.msra.mxu1 %v120_v25  ;;  %183 = vmatpush.msra.mxu2 %v166_v39 }
  0x27   :  { %107 = vmatpush.msra.mxu0 %v78_v22 }
  0x28   :  { %148 = vmatpush.msra.mxu1 %v119_v27  ;;  %184 = vmatpush.msra.mxu2 %v165_v40 }
  0x29   :  { %108 = vmatpush.msra.mxu0 %v77_v24 }
  0x2a   :  { %149 = vmatpush.msra.mxu1 %v118_v30  ;;  %185 = vmatpush.msra.mxu2 %v164_v41 }
  0x2b   :  { %109 = vmatpush.msra.mxu0 %v76_v26 }
  0x2c   :  { %150 = vmatpush.msra.mxu1 %v117_v31  ;;  %186 = vmatpush.msra.mxu2 %v163_v42 }
  0x2d   :  { %110 = vmatpush.msra.mxu0 %v75_v28 }
  0x2e   :  { %111 = vmatmul.f32.vlgmr.msra.gmra.mxu0 %v74_v29  ;;  %151 = vmatpush.msra.mxu1 %v116_v32 }
  0x2f   :  { %187 = vmatpush.msra.mxu2 %v162_v43 }
  0x31   :  { %188 = vmatpush.msra.mxu2 %v161_v44 }
  0x33   :  { %189 = vmatpush.msra.mxu2 %v160_v45 }
  0x35   :  { %190 = vmatpush.msra.mxu2 %v159_v50 }
  0x37   :  { %191 = vmatpush.msra.mxu2 %v158_v51 }
  0x39   :  { %192 = vmatpush.msra.mxu2 %v157_v52 }
  0xab   :  { %v112_v47 = vpop.f32.mrf.mxu0 }
  0xac   :  { %v113_v48 = vadd.f32 %v222_v46, %v112_v47 }
  0xae   :  { %v115_v49 = vmax.f32 %v113_v48, 0.0 }
  0xb0   :  { %152 = vmatmul.f32.vlgmr.msra.gmra.mxu1 %v115_v49 }
 0x12d   :  { %v153_v54 = vpop.f32.mrf.mxu1 }
 0x12e   :  { %v154_v55 = vadd.f32 %v223_v53, %v153_v54 }
 0x130   :  { %v156_v56 = vmax.f32 %v154_v55, 0.0 }
 0x132   :  { %193 = vmatmul.f32.vlgmr.msra.gmra.mxu2 %v156_v56 }
 0x1b5   :  { %v194_v58 = vpop.f32.mrf.mxu2 }
 0x1b6   :  { %v195_v59 = vadd.f32 %v224_v57, %v194_v58 }
 0x1b8   :  { %197 = vst [vmem:[#allocation8] sm:$0xff] %v195_v59 }
 0x1b9   :  { %208 = dma.vmem_to_hbm [thread:$0]  %s204_s22, 128, %s206_s25, [#allocation4]  }
 0x1ba   :  { %325 = dma.done.wait [#allocation4], 128  }
 0x1bb   :  { %326 = vsyncadd [#allocation4], 4294967168 }
 0x1bc   :  { %213 = vsyncpa [#allocation3], 1 }
 0x1bd   :  { %214 = vsyncpa [#allocation6], 1 }
 0x1be   :  { %215 = vsyncpa [#allocation4], 1 }

</bundles_post_ra>
